<compile_context>
chip_gen: v5e
topology: v5e:2x2
jax: 0.10.0
libtpu: 0.0.40
codegen_flags: <defaults>
</compile_context>

<pallas_src>
import jax
import jax.numpy as jnp
from jax.experimental import pallas as pl
from jax.experimental.pallas import tpu as pltpu


def _choose_time_chunk(L, requested):
    """Time-chunk T: multiple of 8 (sublane constraint), capped by `requested`.
    Never falls back to T = L for long sequences (that would blow the VMEM budget);
    non-divisible L is handled by zero-padding + masking in the kernel instead."""
    if L <= 8:
        return L
    return max(8, (min(requested, L) // 8) * 8)


def rnn_forward(x, w_h, w_i, w_o, *, time_chunk=8, compute_dtype=jnp.bfloat16):
    """x: (N, L, input_size) f32.  Returns (y (N, L, H), h (N, H)) like the PyTorch module.

    Matmul operands are computed in `compute_dtype` (bf16 by default, the TPU MXU fast
    path) with f32 accumulation; the tanh, the additions and the hidden-state carry are
    kept in f32.  Pass compute_dtype=jnp.float32 for full-f32 matmuls.
    """
    N, L, I = x.shape
    H = w_h.shape[0]

    T = _choose_time_chunk(L, time_chunk)
    num_chunks = -(-L // T)          # ceil div
    L_pad = num_chunks * T
    padded = L_pad != L
    if padded:
        x = jnp.pad(x, ((0, 0), (0, L_pad - L), (0, 0)))

    # Weights stored in the matmul compute dtype (halves weight VMEM / DMA).
    w_h_c = w_h.astype(compute_dtype)
    w_i_c = w_i.astype(compute_dtype)
    w_o_c = w_o.astype(compute_dtype)

    def rnn_kernel(x_ref, wh_ref, wi_ref, wo_ref, y_ref, h_ref, h_stage):
        """One grid step = one chunk of T time steps.

        x_ref:   (N, T, I)   input chunk
        wh_ref:  (H, H)      recurrent weight (compute dtype)
        wi_ref:  (I, H)      input weight (compute dtype)
        wo_ref:  (H, H)      output projection (compute dtype)
        y_ref:   (N, T, H)   output chunk, written exactly once per chunk
        h_ref:   (N, H) f32  final hidden state; resident block doubles as the carry
        h_stage: (N, T, H) f32 VMEM scratch staging the chunk's hidden states
        """
        c = pl.program_id(0)
        Nb, Tb, Hb = y_ref.shape
        Ib = x_ref.shape[-1]

        @pl.when(c == 0)
        def _init():
            h_ref[...] = jnp.zeros_like(h_ref)

        # ---- hoisted input projection for the whole chunk (no serial dependence):
        # one throughput-friendly (N*T, I) @ (I, H) MXU matmul, f32 accumulation.
        x_flat = x_ref[...].reshape(Nb * Tb, Ib).astype(compute_dtype)
        xw = jnp.dot(
            x_flat, wi_ref[...], preferred_element_type=jnp.float32
        ).reshape(Nb, Tb, Hb)

        # ---- serial recurrence over the T steps (fully unrolled; T is static).
        # Per step: one (N, H) @ (H, H) matmul, f32 add + tanh, dense scratch store.
        # TODO(synk): hold wh resident in the MXU via pltpu.matmul_push_rhs/acc_lhs/pop
        # to avoid re-pushing the RHS each serial step (worthwhile at H >= 128).
        h = h_ref[...]                                            # (N, H) f32
        for t in range(Tb):
            h_new = jnp.tanh(
                jnp.dot(h.astype(compute_dtype), wh_ref[...],
                        preferred_element_type=jnp.float32)
                + xw[:, t, :]
            )
            if padded:
                # Freeze h on zero-padded tail steps so h_final stays exact.
                h_new = jnp.where(c * Tb + t < L, h_new, h)
            h = h_new
            h_stage[:, t, :] = h                                  # f32 staging
        h_ref[...] = h                                            # carry / final state

        # ---- chunk-level output projection, off the serial path; y written once.
        hs = h_stage[...].reshape(Nb * Tb, Hb).astype(compute_dtype)
        y_ref[...] = (
            jnp.dot(hs, wo_ref[...], preferred_element_type=jnp.float32)
            .reshape(Nb, Tb, Hb)
            .astype(y_ref.dtype)
        )

    grid_spec = pltpu.PrefetchScalarGridSpec(
        num_scalar_prefetch=0,
        grid=(num_chunks,),
        in_specs=[
            pl.BlockSpec((N, T, I), lambda c: (0, c, 0)),   # x chunk (native layout)
            pl.BlockSpec((H, H), lambda c: (0, 0)),         # w_h
            pl.BlockSpec((I, H), lambda c: (0, 0)),         # w_i
            pl.BlockSpec((H, H), lambda c: (0, 0)),         # w_o
        ],
        out_specs=[
            pl.BlockSpec((N, T, H), lambda c: (0, c, 0)),   # y chunk (native layout)
            pl.BlockSpec((N, H), lambda c: (0, 0)),         # final h (resident carry)
        ],
        scratch_shapes=[pltpu.VMEM((N, T, H), jnp.float32)],  # staged hidden states
    )

    y, h_final = pl.pallas_call(
        rnn_kernel,
        grid_spec=grid_spec,
        out_shape=(
            jax.ShapeDtypeStruct((N, L_pad, H), jnp.float32),
            jax.ShapeDtypeStruct((N, H), jnp.float32),
        ),
        compiler_params=pltpu.CompilerParams(
            # The hidden state carries across chunks -> time axis is sequential.
            dimension_semantics=("arbitrary",),
            vmem_limit_bytes=32 * 1024 * 1024,
        ),
    )(x, w_h_c, w_i_c, w_o_c)

    if padded:
        y = y[:, :L]
    return y, h_final


def rnn_reference(x, w_h, w_i, w_o, compute_dtype=jnp.bfloat16):
    """Pure-JAX reference matching the PyTorch module (no biases, h0 = 0), using the
    same mixed-precision matmul policy as the kernel (operands in compute_dtype, f32
    accumulation, f32 tanh/add/carry)."""
    N, L, I = x.shape
    H = w_h.shape[0]
    w_h_c = w_h.astype(compute_dtype)
    w_i_c = w_i.astype(compute_dtype)
    w_o_c = w_o.astype(compute_dtype)
    h = jnp.zeros((N, H), jnp.float32)
    ys = []
    for t in range(L):
        pre = (
            jnp.dot(h.astype(compute_dtype), w_h_c, preferred_element_type=jnp.float32)
            + jnp.dot(x[:, t].astype(compute_dtype), w_i_c,
                      preferred_element_type=jnp.float32)
        )
        h = jnp.tanh(pre)
        ys.append(jnp.dot(h.astype(compute_dtype), w_o_c,
                          preferred_element_type=jnp.float32))
    return jnp.stack(ys, axis=1), h


if __name__ == "__main__":
    # Small shapes consistent with the module's forward: x (N, L, input_size)
    N, L, input_size, hidden_size = 2, 16, 16, 32

    key = jax.random.PRNGKey(0)
    kx, kwh, kwi, kwo = jax.random.split(key, 4)

    x = jax.random.normal(kx, (N, L, input_size), dtype=jnp.float32)
    # torch.randn-style deterministic parameter init
    w_h = jax.random.normal(kwh, (hidden_size, hidden_size), dtype=jnp.float32)
    w_i = jax.random.normal(kwi, (input_size, hidden_size), dtype=jnp.float32)
    w_o = jax.random.normal(kwo, (hidden_size, hidden_size), dtype=jnp.float32)

    # time_chunk=8 -> 2 chunks of 8 steps: exercises the cross-chunk hidden carry.
    y, h = jax.jit(rnn_forward)(x, w_h, w_i, w_o)
    jax.block_until_ready((y, h))

    y_ref, h_ref = rnn_reference(x, w_h, w_i, w_o)
    assert y.shape == (N, L, hidden_size) and h.shape == (N, hidden_size)
    err_y = float(jnp.max(jnp.abs(y - y_ref)))
    err_h = float(jnp.max(jnp.abs(h - h_ref)))
    # Kernel and reference use identical operand dtypes / reduction structure; the
    # tolerance only has to cover MXU-vs-XLA summation-order and tanh-approx deltas.
    assert jnp.allclose(y, y_ref, atol=2e-3, rtol=2e-3), err_y
    assert jnp.allclose(h, h_ref, atol=2e-3, rtol=2e-3), err_h

    print("KERNEL_OK")
</pallas_src>

<mosaic_0001>
module attributes {stable_mosaic.version = 11 : i64} {
  func.func @rnn_kernel(%arg0: i32, %arg1: memref<2x8x16xf32, #tpu.memory_space<vmem>>, %arg2: memref<32x32xbf16, #tpu.memory_space<vmem>>, %arg3: memref<16x32xbf16, #tpu.memory_space<vmem>>, %arg4: memref<32x32xbf16, #tpu.memory_space<vmem>>, %arg5: memref<2x8x32xf32, #tpu.memory_space<vmem>>, %arg6: memref<2x32xf32, #tpu.memory_space<vmem>>, %arg7: memref<2x8x32xf32, #tpu.memory_space<vmem>>) attributes {dimension_semantics = [#tpu.dimension_semantics<arbitrary>], iteration_bounds = array<i64: 2>, scalar_prefetch = 0 : i64, scratch_operands = 1 : i64, tpu.core_type = #tpu.core_type<tc>, window_params = [{transform_indices = @transform_0, window_bounds = array<i64: 2, 8, 16>}, {pipeline_mode = #tpu.pipeline_mode<synchronous>, transform_indices = @transform_1, window_bounds = array<i64: 32, 32>}, {pipeline_mode = #tpu.pipeline_mode<synchronous>, transform_indices = @transform_2, window_bounds = array<i64: 16, 32>}, {pipeline_mode = #tpu.pipeline_mode<synchronous>, transform_indices = @transform_3, window_bounds = array<i64: 32, 32>}, {transform_indices = @transform_4, window_bounds = array<i64: 2, 8, 32>}, {pipeline_mode = #tpu.pipeline_mode<synchronous>, transform_indices = @transform_5, window_bounds = array<i64: 2, 32>}]} {
    %c0_i32 = arith.constant 0 : i32
    %0 = arith.cmpi eq, %arg0, %c0_i32 : i32
    %1 = arith.extui %0 : i1 to i32
    %c0_i32_0 = arith.constant 0 : i32
    %2 = arith.cmpi ne, %1, %c0_i32_0 : i32
    scf.if %2 {
      %cst_59 = arith.constant 0.000000e+00 : f32
      %98 = vector.broadcast %cst_59 : f32 to vector<2x32xf32>
      %c0_60 = arith.constant 0 : index
      %c0_61 = arith.constant 0 : index
      %99 = vector.load %arg6[%c0_60, %c0_61] : memref<2x32xf32, #tpu.memory_space<vmem>>, vector<2x32xf32>
      tpu.vector_store %arg6[%c0_60, %c0_61], %98 {strides = array<i32>} : memref<2x32xf32, #tpu.memory_space<vmem>>, vector<2x32xf32>,
    } else {
    }
    %c0 = arith.constant 0 : index
    %c0_1 = arith.constant 0 : index
    %c0_2 = arith.constant 0 : index
    %3 = vector.load %arg1[%c0, %c0_1, %c0_2] : memref<2x8x16xf32, #tpu.memory_space<vmem>>, vector<2x8x16xf32>
    %4 = vector.shape_cast %3 : vector<2x8x16xf32> to vector<16x16xf32>
    %5 = arith.truncf %4 : vector<16x16xf32> to vector<16x16xbf16>
    %c0_3 = arith.constant 0 : index
    %c0_4 = arith.constant 0 : index
    %6 = vector.load %arg3[%c0_3, %c0_4] : memref<16x32xbf16, #tpu.memory_space<vmem>>, vector<16x32xbf16>
    %cst = arith.constant dense<0.000000e+00> : vector<16x32xf32>
    %7 = tpu.matmul %5, %6, %cst {dimension_numbers = #tpu.dot_dimension_numbers<[1], [0], [0], [1], [0, 0, 1, 1], [], []>} : vector<16x16xbf16>, vector<16x32xbf16>, vector<16x32xf32> -> vector<16x32xf32>
    %8 = vector.shape_cast %7 : vector<16x32xf32> to vector<2x8x32xf32>
    %c0_5 = arith.constant 0 : index
    %c0_6 = arith.constant 0 : index
    %9 = vector.load %arg6[%c0_5, %c0_6] : memref<2x32xf32, #tpu.memory_space<vmem>>, vector<2x32xf32>
    %10 = arith.truncf %9 : vector<2x32xf32> to vector<2x32xbf16>
    %c0_7 = arith.constant 0 : index
    %c0_8 = arith.constant 0 : index
    %11 = vector.load %arg2[%c0_7, %c0_8] : memref<32x32xbf16, #tpu.memory_space<vmem>>, vector<32x32xbf16>
    %cst_9 = arith.constant dense<0.000000e+00> : vector<2x32xf32>
    %12 = tpu.matmul %10, %11, %cst_9 {dimension_numbers = #tpu.dot_dimension_numbers<[1], [0], [0], [1], [0, 0, 1, 1], [], []>} : vector<2x32xbf16>, vector<32x32xbf16>, vector<2x32xf32> -> vector<2x32xf32>
    %13 = vector.extract_strided_slice %8 {offsets = [0, 0, 0], sizes = [2, 1, 32], strides = [1, 1, 1]} : vector<2x8x32xf32> to vector<2x1x32xf32>
    %14 = vector.shape_cast %13 : vector<2x1x32xf32> to vector<2x32xf32>
    %15 = arith.addf %12, %14 : vector<2x32xf32>
    %16 = math.tanh %15 : vector<2x32xf32>
    %c0_10 = arith.constant 0 : index
    %c0_11 = arith.constant 0 : index
    %c0_12 = arith.constant 0 : index
    %17 = vector.load %arg7[%c0_10, %c0_11, %c0_12] : memref<2x8x32xf32, #tpu.memory_space<vmem>>, vector<2x1x32xf32>
    %18 = vector.shape_cast %17 : vector<2x1x32xf32> to vector<2x32xf32>
    %19 = vector.shape_cast %16 : vector<2x32xf32> to vector<2x1x32xf32>
    tpu.vector_store %arg7[%c0_10, %c0_11, %c0_12], %19 {strides = array<i32>} : memref<2x8x32xf32, #tpu.memory_space<vmem>>, vector<2x1x32xf32>,
    %20 = arith.truncf %16 : vector<2x32xf32> to vector<2x32xbf16>
    %c0_13 = arith.constant 0 : index
    %c0_14 = arith.constant 0 : index
    %21 = vector.load %arg2[%c0_13, %c0_14] : memref<32x32xbf16, #tpu.memory_space<vmem>>, vector<32x32xbf16>
    %cst_15 = arith.constant dense<0.000000e+00> : vector<2x32xf32>
    %22 = tpu.matmul %20, %21, %cst_15 {dimension_numbers = #tpu.dot_dimension_numbers<[1], [0], [0], [1], [0, 0, 1, 1], [], []>} : vector<2x32xbf16>, vector<32x32xbf16>, vector<2x32xf32> -> vector<2x32xf32>
    %23 = vector.extract_strided_slice %8 {offsets = [0, 1, 0], sizes = [2, 1, 32], strides = [1, 1, 1]} : vector<2x8x32xf32> to vector<2x1x32xf32>
    %24 = vector.shape_cast %23 : vector<2x1x32xf32> to vector<2x32xf32>
    %25 = arith.addf %22, %24 : vector<2x32xf32>
    %26 = math.tanh %25 : vector<2x32xf32>
    %c0_16 = arith.constant 0 : index
    %c1 = arith.constant 1 : index
    %c0_17 = arith.constant 0 : index
    %27 = vector.load %arg7[%c0_16, %c1, %c0_17] : memref<2x8x32xf32, #tpu.memory_space<vmem>>, vector<2x1x32xf32>
    %28 = vector.shape_cast %27 : vector<2x1x32xf32> to vector<2x32xf32>
    %29 = vector.shape_cast %26 : vector<2x32xf32> to vector<2x1x32xf32>
    tpu.vector_store %arg7[%c0_16, %c1, %c0_17], %29 {strides = array<i32>} : memref<2x8x32xf32, #tpu.memory_space<vmem>>, vector<2x1x32xf32>,
    %30 = arith.truncf %26 : vector<2x32xf32> to vector<2x32xbf16>
    %c0_18 = arith.constant 0 : index
    %c0_19 = arith.constant 0 : index
    %31 = vector.load %arg2[%c0_18, %c0_19] : memref<32x32xbf16, #tpu.memory_space<vmem>>, vector<32x32xbf16>
    %cst_20 = arith.constant dense<0.000000e+00> : vector<2x32xf32>
    %32 = tpu.matmul %30, %31, %cst_20 {dimension_numbers = #tpu.dot_dimension_numbers<[1], [0], [0], [1], [0, 0, 1, 1], [], []>} : vector<2x32xbf16>, vector<32x32xbf16>, vector<2x32xf32> -> vector<2x32xf32>
    %33 = vector.extract_strided_slice %8 {offsets = [0, 2, 0], sizes = [2, 1, 32], strides = [1, 1, 1]} : vector<2x8x32xf32> to vector<2x1x32xf32>
    %34 = vector.shape_cast %33 : vector<2x1x32xf32> to vector<2x32xf32>
    %35 = arith.addf %32, %34 : vector<2x32xf32>
    %36 = math.tanh %35 : vector<2x32xf32>
    %c0_21 = arith.constant 0 : index
    %c2 = arith.constant 2 : index
    %c0_22 = arith.constant 0 : index
    %37 = vector.load %arg7[%c0_21, %c2, %c0_22] : memref<2x8x32xf32, #tpu.memory_space<vmem>>, vector<2x1x32xf32>
    %38 = vector.shape_cast %37 : vector<2x1x32xf32> to vector<2x32xf32>
    %39 = vector.shape_cast %36 : vector<2x32xf32> to vector<2x1x32xf32>
    tpu.vector_store %arg7[%c0_21, %c2, %c0_22], %39 {strides = array<i32>} : memref<2x8x32xf32, #tpu.memory_space<vmem>>, vector<2x1x32xf32>,
    %40 = arith.truncf %36 : vector<2x32xf32> to vector<2x32xbf16>
    %c0_23 = arith.constant 0 : index
    %c0_24 = arith.constant 0 : index
    %41 = vector.load %arg2[%c0_23, %c0_24] : memref<32x32xbf16, #tpu.memory_space<vmem>>, vector<32x32xbf16>
    %cst_25 = arith.constant dense<0.000000e+00> : vector<2x32xf32>
    %42 = tpu.matmul %40, %41, %cst_25 {dimension_numbers = #tpu.dot_dimension_numbers<[1], [0], [0], [1], [0, 0, 1, 1], [], []>} : vector<2x32xbf16>, vector<32x32xbf16>, vector<2x32xf32> -> vector<2x32xf32>
    %43 = vector.extract_strided_slice %8 {offsets = [0, 3, 0], sizes = [2, 1, 32], strides = [1, 1, 1]} : vector<2x8x32xf32> to vector<2x1x32xf32>
    %44 = vector.shape_cast %43 : vector<2x1x32xf32> to vector<2x32xf32>
    %45 = arith.addf %42, %44 : vector<2x32xf32>
    %46 = math.tanh %45 : vector<2x32xf32>
    %c0_26 = arith.constant 0 : index
    %c3 = arith.constant 3 : index
    %c0_27 = arith.constant 0 : index
    %47 = vector.load %arg7[%c0_26, %c3, %c0_27] : memref<2x8x32xf32, #tpu.memory_space<vmem>>, vector<2x1x32xf32>
    %48 = vector.shape_cast %47 : vector<2x1x32xf32> to vector<2x32xf32>
    %49 = vector.shape_cast %46 : vector<2x32xf32> to vector<2x1x32xf32>
    tpu.vector_store %arg7[%c0_26, %c3, %c0_27], %49 {strides = array<i32>} : memref<2x8x32xf32, #tpu.memory_space<vmem>>, vector<2x1x32xf32>,
    %50 = arith.truncf %46 : vector<2x32xf32> to vector<2x32xbf16>
    %c0_28 = arith.constant 0 : index
    %c0_29 = arith.constant 0 : index
    %51 = vector.load %arg2[%c0_28, %c0_29] : memref<32x32xbf16, #tpu.memory_space<vmem>>, vector<32x32xbf16>
    %cst_30 = arith.constant dense<0.000000e+00> : vector<2x32xf32>
    %52 = tpu.matmul %50, %51, %cst_30 {dimension_numbers = #tpu.dot_dimension_numbers<[1], [0], [0], [1], [0, 0, 1, 1], [], []>} : vector<2x32xbf16>, vector<32x32xbf16>, vector<2x32xf32> -> vector<2x32xf32>
    %53 = vector.extract_strided_slice %8 {offsets = [0, 4, 0], sizes = [2, 1, 32], strides = [1, 1, 1]} : vector<2x8x32xf32> to vector<2x1x32xf32>
    %54 = vector.shape_cast %53 : vector<2x1x32xf32> to vector<2x32xf32>
    %55 = arith.addf %52, %54 : vector<2x32xf32>
    %56 = math.tanh %55 : vector<2x32xf32>
    %c0_31 = arith.constant 0 : index
    %c4 = arith.constant 4 : index
    %c0_32 = arith.constant 0 : index
    %57 = vector.load %arg7[%c0_31, %c4, %c0_32] : memref<2x8x32xf32, #tpu.memory_space<vmem>>, vector<2x1x32xf32>
    %58 = vector.shape_cast %57 : vector<2x1x32xf32> to vector<2x32xf32>
    %59 = vector.shape_cast %56 : vector<2x32xf32> to vector<2x1x32xf32>
    tpu.vector_store %arg7[%c0_31, %c4, %c0_32], %59 {strides = array<i32>} : memref<2x8x32xf32, #tpu.memory_space<vmem>>, vector<2x1x32xf32>,
    %60 = arith.truncf %56 : vector<2x32xf32> to vector<2x32xbf16>
    %c0_33 = arith.constant 0 : index
    %c0_34 = arith.constant 0 : index
    %61 = vector.load %arg2[%c0_33, %c0_34] : memref<32x32xbf16, #tpu.memory_space<vmem>>, vector<32x32xbf16>
    %cst_35 = arith.constant dense<0.000000e+00> : vector<2x32xf32>
    %62 = tpu.matmul %60, %61, %cst_35 {dimension_numbers = #tpu.dot_dimension_numbers<[1], [0], [0], [1], [0, 0, 1, 1], [], []>} : vector<2x32xbf16>, vector<32x32xbf16>, vector<2x32xf32> -> vector<2x32xf32>
    %63 = vector.extract_strided_slice %8 {offsets = [0, 5, 0], sizes = [2, 1, 32], strides = [1, 1, 1]} : vector<2x8x32xf32> to vector<2x1x32xf32>
    %64 = vector.shape_cast %63 : vector<2x1x32xf32> to vector<2x32xf32>
    %65 = arith.addf %62, %64 : vector<2x32xf32>
    %66 = math.tanh %65 : vector<2x32xf32>
    %c0_36 = arith.constant 0 : index
    %c5 = arith.constant 5 : index
    %c0_37 = arith.constant 0 : index
    %67 = vector.load %arg7[%c0_36, %c5, %c0_37] : memref<2x8x32xf32, #tpu.memory_space<vmem>>, vector<2x1x32xf32>
    %68 = vector.shape_cast %67 : vector<2x1x32xf32> to vector<2x32xf32>
    %69 = vector.shape_cast %66 : vector<2x32xf32> to vector<2x1x32xf32>
    tpu.vector_store %arg7[%c0_36, %c5, %c0_37], %69 {strides = array<i32>} : memref<2x8x32xf32, #tpu.memory_space<vmem>>, vector<2x1x32xf32>,
    %70 = arith.truncf %66 : vector<2x32xf32> to vector<2x32xbf16>
    %c0_38 = arith.constant 0 : index
    %c0_39 = arith.constant 0 : index
    %71 = vector.load %arg2[%c0_38, %c0_39] : memref<32x32xbf16, #tpu.memory_space<vmem>>, vector<32x32xbf16>
    %cst_40 = arith.constant dense<0.000000e+00> : vector<2x32xf32>
    %72 = tpu.matmul %70, %71, %cst_40 {dimension_numbers = #tpu.dot_dimension_numbers<[1], [0], [0], [1], [0, 0, 1, 1], [], []>} : vector<2x32xbf16>, vector<32x32xbf16>, vector<2x32xf32> -> vector<2x32xf32>
    %73 = vector.extract_strided_slice %8 {offsets = [0, 6, 0], sizes = [2, 1, 32], strides = [1, 1, 1]} : vector<2x8x32xf32> to vector<2x1x32xf32>
    %74 = vector.shape_cast %73 : vector<2x1x32xf32> to vector<2x32xf32>
    %75 = arith.addf %72, %74 : vector<2x32xf32>
    %76 = math.tanh %75 : vector<2x32xf32>
    %c0_41 = arith.constant 0 : index
    %c6 = arith.constant 6 : index
    %c0_42 = arith.constant 0 : index
    %77 = vector.load %arg7[%c0_41, %c6, %c0_42] : memref<2x8x32xf32, #tpu.memory_space<vmem>>, vector<2x1x32xf32>
    %78 = vector.shape_cast %77 : vector<2x1x32xf32> to vector<2x32xf32>
    %79 = vector.shape_cast %76 : vector<2x32xf32> to vector<2x1x32xf32>
    tpu.vector_store %arg7[%c0_41, %c6, %c0_42], %79 {strides = array<i32>} : memref<2x8x32xf32, #tpu.memory_space<vmem>>, vector<2x1x32xf32>,
    %80 = arith.truncf %76 : vector<2x32xf32> to vector<2x32xbf16>
    %c0_43 = arith.constant 0 : index
    %c0_44 = arith.constant 0 : index
    %81 = vector.load %arg2[%c0_43, %c0_44] : memref<32x32xbf16, #tpu.memory_space<vmem>>, vector<32x32xbf16>
    %cst_45 = arith.constant dense<0.000000e+00> : vector<2x32xf32>
    %82 = tpu.matmul %80, %81, %cst_45 {dimension_numbers = #tpu.dot_dimension_numbers<[1], [0], [0], [1], [0, 0, 1, 1], [], []>} : vector<2x32xbf16>, vector<32x32xbf16>, vector<2x32xf32> -> vector<2x32xf32>
    %83 = vector.extract_strided_slice %8 {offsets = [0, 7, 0], sizes = [2, 1, 32], strides = [1, 1, 1]} : vector<2x8x32xf32> to vector<2x1x32xf32>
    %84 = vector.shape_cast %83 : vector<2x1x32xf32> to vector<2x32xf32>
    %85 = arith.addf %82, %84 : vector<2x32xf32>
    %86 = math.tanh %85 : vector<2x32xf32>
    %c0_46 = arith.constant 0 : index
    %c7 = arith.constant 7 : index
    %c0_47 = arith.constant 0 : index
    %87 = vector.load %arg7[%c0_46, %c7, %c0_47] : memref<2x8x32xf32, #tpu.memory_space<vmem>>, vector<2x1x32xf32>
    %88 = vector.shape_cast %87 : vector<2x1x32xf32> to vector<2x32xf32>
    %89 = vector.shape_cast %86 : vector<2x32xf32> to vector<2x1x32xf32>
    tpu.vector_store %arg7[%c0_46, %c7, %c0_47], %89 {strides = array<i32>} : memref<2x8x32xf32, #tpu.memory_space<vmem>>, vector<2x1x32xf32>,
    %c0_48 = arith.constant 0 : index
    %c0_49 = arith.constant 0 : index
    %90 = vector.load %arg6[%c0_48, %c0_49] : memref<2x32xf32, #tpu.memory_space<vmem>>, vector<2x32xf32>
    tpu.vector_store %arg6[%c0_48, %c0_49], %86 {strides = array<i32>} : memref<2x32xf32, #tpu.memory_space<vmem>>, vector<2x32xf32>,
    %c0_50 = arith.constant 0 : index
    %c0_51 = arith.constant 0 : index
    %c0_52 = arith.constant 0 : index
    %91 = vector.load %arg7[%c0_50, %c0_51, %c0_52] : memref<2x8x32xf32, #tpu.memory_space<vmem>>, vector<2x8x32xf32>
    %92 = vector.shape_cast %91 : vector<2x8x32xf32> to vector<16x32xf32>
    %93 = arith.truncf %92 : vector<16x32xf32> to vector<16x32xbf16>
    %c0_53 = arith.constant 0 : index
    %c0_54 = arith.constant 0 : index
    %94 = vector.load %arg4[%c0_53, %c0_54] : memref<32x32xbf16, #tpu.memory_space<vmem>>, vector<32x32xbf16>
    %cst_55 = arith.constant dense<0.000000e+00> : vector<16x32xf32>
    %95 = tpu.matmul %93, %94, %cst_55 {dimension_numbers = #tpu.dot_dimension_numbers<[1], [0], [0], [1], [0, 0, 1, 1], [], []>} : vector<16x32xbf16>, vector<32x32xbf16>, vector<16x32xf32> -> vector<16x32xf32>
    %96 = vector.shape_cast %95 : vector<16x32xf32> to vector<2x8x32xf32>
    %c0_56 = arith.constant 0 : index
    %c0_57 = arith.constant 0 : index
    %c0_58 = arith.constant 0 : index
    %97 = vector.load %arg5[%c0_56, %c0_57, %c0_58] : memref<2x8x32xf32, #tpu.memory_space<vmem>>, vector<2x8x32xf32>
    tpu.vector_store %arg5[%c0_56, %c0_57, %c0_58], %96 {strides = array<i32>} : memref<2x8x32xf32, #tpu.memory_space<vmem>>, vector<2x8x32xf32>,
    return
  }
  func.func @transform_0(%arg0: i32) -> (i32, i32, i32) {
    %c0_i32 = arith.constant 0 : i32
    %c0_i32_0 = arith.constant 0 : i32
    %c0_i32_1 = arith.constant 0 : i32
    return %c0_i32, %arg0, %c0_i32_0 : i32, i32, i32
  }
  func.func @transform_1(%arg0: i32) -> (i32, i32) {
    %c0_i32 = arith.constant 0 : i32
    %c0_i32_0 = arith.constant 0 : i32
    %c0_i32_1 = arith.constant 0 : i32
    return %c0_i32, %c0_i32_0 : i32, i32
  }
  func.func @transform_2(%arg0: i32) -> (i32, i32) {
    %c0_i32 = arith.constant 0 : i32
    %c0_i32_0 = arith.constant 0 : i32
    %c0_i32_1 = arith.constant 0 : i32
    return %c0_i32, %c0_i32_0 : i32, i32
  }
  func.func @transform_3(%arg0: i32) -> (i32, i32) {
    %c0_i32 = arith.constant 0 : i32
    %c0_i32_0 = arith.constant 0 : i32
    %c0_i32_1 = arith.constant 0 : i32
    return %c0_i32, %c0_i32_0 : i32, i32
  }
  func.func @transform_4(%arg0: i32) -> (i32, i32, i32) {
    %c0_i32 = arith.constant 0 : i32
    %c0_i32_0 = arith.constant 0 : i32
    %c0_i32_1 = arith.constant 0 : i32
    return %c0_i32, %arg0, %c0_i32_0 : i32, i32, i32
  }
  func.func @transform_5(%arg0: i32) -> (i32, i32) {
    %c0_i32 = arith.constant 0 : i32
    %c0_i32_0 = arith.constant 0 : i32
    %c0_i32_1 = arith.constant 0 : i32
    return %c0_i32, %c0_i32_0 : i32, i32
  }
}

</mosaic_0001>

<bundles_post_ra>
// kernel: rnn_forward.1
= control target key start
LH: loop header
LB: loop body
LE: loop exit
PB: predicated region body
PF: predicated region fallthrough
CT: control target
= control target key end

     0   :  { %11 = vsyncpa [#allocation5], 0  ;;  %s1321_s0 = inlined_call_operand.vmem [shape: f32[2,16,16], index: 0, kind: input, shape index: {}]   ;;  %s1322_s1 = inlined_call_operand.vmem [shape: bf16[32,32], index: 1, kind: input, shape index: {}]   ;;  %s1323_s2 = inlined_call_operand.vmem [shape: bf16[16,32], index: 2, kind: input, shape index: {}]   ;;  %s1324_s3 = inlined_call_operand.vmem [shape: bf16[32,32], index: 3, kind: input, shape index: {}]   ;;  %s1325_s4 = inlined_call_operand.hbm [shape: f32[2,16,32], index: 4, kind: output, shape index: {0}]   ;;  %s1326_s5 = inlined_call_operand.hbm [shape: f32[2,32], index: 5, kind: output, shape index: {1}]  }
   0x1   :  { %13 = vsyncpa [#allocation5 + $0x1], 0 }
   0x2   :  { %14 = vsyncpa [#allocation7], 0  ;;  %s1109_s18 = smov 0   ;;  %s1111_s19 = smov 0  }
   0x3   :  { %s1113_s20 = smov 0   ;;  %s1115_s21 = smov 0  }
   0x4 LB: > { %s1130_s22 = sadd.s32 4294967295, %s1072_s21   ;;  %s792_s23 = sadd.s32 4294967294, %s1072_s21   ;;  %s1072_s21 = sphi %s1115_s21, %s1332_s21   ;;  %s1068_s20 = sphi %s1113_s20, %s1331_s20   ;;  %s1064_s19 = sphi %s1111_s19, %s1330_s19   ;;  %s1060_s18 = sphi %s1109_s18, %s1329_s18  }
   0x5   : > { %s1134_s24 = sadd.s32 1, %s1072_s21   ;;  %s27_s25 = sadd.s32 1, %s1068_s20 }
   0x6   : > { %s24_s26 = ssub.s32 %s1072_s21, %s1134_s24  ;;  %p34_p0 = scmp.ne.s32.totalorder %s1068_s20, %s1064_s19 }
   0x7   : > { %p25_p1 = scmp.eq.s32.totalorder %s24_s26, 0  ;;  %p35_p2 = scmp.eq.s32.totalorder %s1072_s21, 0 }
   0x8   : > { %p127_p3 = scmp.eq.s32.totalorder %s1130_s22, 1  ;;  %p132_p4 = scmp.ne.s32.totalorder %s1064_s19, %s1060_s18 }
   0x9   : > { %s1146_s27 = scalar_select %p25_p1, %s1068_s20, %s27_s25  }
   0xa   : > { %p36_p5 = por %p35_p2, %p34_p0  ;;  %p1150_p6 = por %p127_p3, %p34_p0 }
   0xb   : > { %p133_p7 = scmp.eq.s32.totalorder %s792_s23, 1  ;;  %p794_p9 = scmp.ge.s32.totalorder %s1072_s21, 2 }
   0xd   : > { %p1154_p8 = por %p133_p7, %p132_p4  ;;  %179 = sbr.rel (%p794_p9) target bundleno = 24 (0x18), region = 28 }
  0x12   : > { %182 = sbr.rel (!%p36_p5) target bundleno = 24 (0x18), region = 32  ;;  %s184_s30 = sand.u32 (%p36_p5), 1, %s1068_s20  }
  0x13   : > { %s796_s6 = sshll.u32 (%p36_p5), %s1072_s21, 3  ;;  %s795_s7 = sshll.u32 (%p36_p5), %s184_s30, 4 }
  0x14   : > { %s188_s10 = scalar_lea.vmem (%p36_p5), %s1321_s0, %s796_s6  ;;  %s186_s11 = scalar_lea.vmem (%p36_p5), [#allocation3], %s795_s7 }
  0x15   : > { %v219_v0 = vld [vmem:[%s188_s10] sm:$0xff] (%p36_p5)  ;;  %v221_v1 = vld [vmem:[%s188_s10 + $0x10] sm:$0xff] (%p36_p5) }
  0x16   : > { %220 = vst [vmem:[%s186_s11] sm:$0xff] (%p36_p5), %v219_v0 }
  0x17   : > { %222 = vst [vmem:[%s186_s11 + $0x8] sm:$0xff] %v221_v1 }
  0x18 PF: > { %p797_p10 = scmp.ge.s32.totalorder %s1072_s21, 1  ;;  %p227_p11 = scmp.lt.s32.totalorder %s1072_s21, 3 }
  0x1a   : > { %p228_p12 = pnand %p797_p10, %p227_p11 }
  0x1b   : > { %s234_s12 = sand.u32 (!%p228_p12), 1, %s1064_s19   ;;  %p800_p13 = scmp.ne.s32.totalorder (!%p228_p12), %s1130_s22, 0 }
  0x1c   : > { %231 = sbr.rel (%p228_p12) target bundleno = 1326 (0x52e), region = 70  ;;  %s798_s13 = sshll.u32 (!%p228_p12), %s234_s12, 4 }
  0x1d   : > { %s236_s14 = scalar_lea.vmem (!%p228_p12), [#allocation3], %s798_s13  ;;  %s1171_s15 = scalar_lea.vmem (!%p228_p12), [#allocation4], %s798_s13 }
  0x21   : > { %265 = sbr.rel (%p800_p13) target bundleno = 40 (0x28), region = 78 }
  0x26   : > { %vm266_vm0 = vcmask 254976   ;;  %v1074_v2 = vmov 0.0  }
  0x27   : > { %267 = vst.msk [vmem:[#allocation6] sm:$0x3] %vm266_vm0, %v1074_v2 }
  0x28 PF: > { %v893_v3 = vld [vmem:[%s1323_s2] sm:$0xff]  ;;  %v895_v4 = vld [vmem:[%s1322_s1 + $0x8] sm:$0xff]  ;;  %vm279_vm1 = vcmask 130048   ;;  %vm321_vm2 = vcmask 261120   ;;  %vm318_vm3 = vcmask 1041409   ;;  %vm342_vm4 = vcmask 253952  }
  0x29   : > { %v268_v5 = vld [vmem:[%s236_s14] sm:$0xff]  ;;  %v269_v6 = vld [vmem:[%s236_s14 + $0x8] sm:$0xff]  ;;  %290 = vmatpush.bf16.msra.mxu0 %v893_v3  ;;  %331 = vmatpush.bf16.msra.mxu1 %v895_v4  ;;  %vm645_vm5 = vcmask 254976   ;;  %s1075_s10 = smov [#allocation6]   ;;  %s714_s16 = sshll.u32 %s1326_s5, 4  ;;  %s715_s16 = int_to_ptr.hbm [resolvable:$true] %s714_s16 }
  0x2a   : > { %v270_v7 = vpack.c.bf16 %v269_v6, %v268_v5  ;;  %v894_v8 = vld [vmem:[%s1322_s1] sm:$0xff]  ;;  %v897_v11 = vld [vmem:[%s1322_s1 + $0x8] sm:$0xff]  ;;  %s712_s11 = sshll.u32 %s1075_s10, 4  ;;  %s888_s17 = sshll.u32 %s1130_s22, 3  ;;  %s713_s11 = int_to_ptr.vmem [resolvable:$true] %s712_s11 }
  0x2b   : > { %374 = vmatpush.bf16.msra.mxu2 %v897_v11  ;;  %v896_v12 = vld [vmem:[%s1322_s1] sm:$0xff]  ;;  %v899_v43 = vld [vmem:[%s1322_s1 + $0x8] sm:$0xff]  ;;  %s696_s26 = scalar_lea.hbm %s1325_s4, %s888_s17  ;;  %s697_s30 = sshll.u32 %s1171_s15, 4  ;;  %s698_s30 = int_to_ptr.vmem [resolvable:$true] %s697_s30 }
  0x2c   : > { %805 = vmatmul.msk.bf16.vlgmr.msra.gmra.mxu0 %vm279_vm1, %v270_v7  ;;  %417 = vmatpush.bf16.msra.mxu3 %v899_v43  ;;  %v898_v44 = vld [vmem:[%s1322_s1] sm:$0xff]  ;;  %v901_v45 = vld [vmem:[%s1322_s1 + $0x8] sm:$0xff]  ;;  %s699_s6 = sshll.u32 %s696_s26, 4  ;;  %s686_s7 = scalar_lea.sflag [#allocation5], %s234_s12  ;;  %s700_s6 = int_to_ptr.hbm [resolvable:$true] %s699_s6 }
  0x2d   : > { %332 = vmatpush.bf16.msra.mxu1 %v894_v8  ;;  %460 = vmatpush.bf16.msrb.mxu0 %v901_v45  ;;  %v900_v52 = vld [vmem:[%s1322_s1] sm:$0xff]  ;;  %v903_v53 = vld [vmem:[%s1322_s1 + $0x8] sm:$0xff]  ;;  %s1020_s8 = sshra.s32 %s700_s6, 4  ;;  %s1026_s13 = scalar_lea.hbm %s1325_s4, 32  ;;  %s1021_s8 = int_to_ptr.hbm [resolvable:$true] %s1020_s8 }
  0x2e   : > { %v297_v9 = vld [vmem:[#allocation6] sm:$0x3]  ;;  %v902_v60 = vld [vmem:[%s1322_s1] sm:$0xff]  ;;  %v905_v61 = vld [vmem:[%s1322_s1 + $0x8] sm:$0xff]  ;;  %s1022_s9 = scalar_lea.hbm %s1021_s8, 16  ;;  %p1027_p4 = scmp.lt.s32.totalorder %s1021_s8, %s1325_s4 }
  0x2f   : > { %v298_v10 = vpack.c.bf16 %v297_v9, %v297_v9  ;;  %375 = vmatpush.bf16.msra.mxu2 %v896_v12  ;;  %v904_v4 = vld [vmem:[%s1322_s1] sm:$0xff]  ;;  %v907_v5 = vld [vmem:[%s1322_s1 + $0x8] sm:$0xff]  ;;  %p1023_p0 = scmp.ne.s32.totalorder %s1021_s8, %s1022_s9  ;;  %p1028_p5 = scmp.lt.s32.totalorder %s1026_s13, %s1022_s9 }
  0x30   : > { %418 = vmatpush.bf16.msra.mxu3 %v898_v44  ;;  %v906_v12 = vld [vmem:[%s1322_s1] sm:$0xff] }
  0x31   : > { %814 = vmatmul.msk.bf16.vlgmr.msra.gmra.mxu1 %vm321_vm2, %v298_v10  ;;  %461 = vmatpush.bf16.msrb.mxu0 %v900_v52  ;;  %p1024_p1 = pnand %p1023_p0, %p1150_p6  ;;  %p1029_p7 = por %p1028_p5, %p1027_p4 }
  0x32   : > { %503 = vmatpush.bf16.msrb.mxu1 %v903_v53 }
  0x33   : > { %546 = vmatpush.bf16.msrb.mxu2 %v905_v61  ;;  %p1025_p2 = pneg %p1024_p1 }
  0x34   : > { %589 = vmatpush.bf16.msrb.mxu3 %v907_v5 }
  0x35   : > { %p1030_p10 = pnand %p1029_p7, %p1025_p2 }
  0x36   : > { %504 = vmatpush.bf16.msrb.mxu1 %v902_v60 }
  0x37   : > { %547 = vmatpush.bf16.msrb.mxu2 %v904_v4 }
  0x38   : > { %590 = vmatpush.bf16.msrb.mxu3 %v906_v12 }
  0xa9   : > { %v292_v13 = vpop.f32.mrf.mxu0 }
  0xaa   : > { %v362_v15 = vrot.slane %v292_v13, 1  ;;  %v404_v16 = vrot.slane %v292_v13, 2  ;;  %v447_v18 = vrot.slane %v292_v13, 3  ;;  %v490_v19 = vrot.slane %v292_v13, 4 }
  0xab   : > { %v533_v20 = vrot.slane %v292_v13, 5  ;;  %v576_v21 = vrot.slane %v292_v13, 6  ;;  %v619_v33 = vrot.slane %v292_v13, 7 }
  0xae   : > { %v334_v14 = vpop.f32.mrf.mxu1 }
  0xb1   : > { %v294_v17 = vpop.f32.mrf.mxu0 }
  0xb2   : > { %v317_v22 = vrot.slane %v294_v17, 7  ;;  %v363_v23 = vsel %vm318_vm3, %v294_v17, %v362_v15  ;;  %v405_v24 = vrot.slane %v294_v17, 1  ;;  %v448_v25 = vrot.slane %v294_v17, 2 }
  0xb3   : > { %v491_v26 = vrot.slane %v294_v17, 3  ;;  %v534_v27 = vrot.slane %v294_v17, 4  ;;  %v577_v28 = vrot.slane %v294_v17, 5  ;;  %v620_v29 = vrot.slane %v294_v17, 6 }
  0xb4   : > { %v319_v30 = vsel %vm318_vm3, %v317_v22, %v292_v13  ;;  %v406_v31 = vsel %vm318_vm3, %v405_v24, %v404_v16  ;;  %v449_v32 = vsel %vm318_vm3, %v448_v25, %v447_v18  ;;  %v909_v13 = vld [vmem:[%s1322_s1 + $0x8] sm:$0xff] }
  0xb5   : > { %v335_v35 = vadd.f32 %v334_v14, %v319_v30  ;;  %v492_v36 = vsel %vm318_vm3, %v491_v26, %v490_v19  ;;  %v1196_v37 = vsel %vm318_vm3, %v534_v27, %v533_v20  ;;  %v1199_v38 = vsel %vm318_vm3, %v577_v28, %v576_v21  ;;  %632 = vmatpush.bf16.msra.mxu0 %v909_v13  ;;  %v908_v20 = vld [vmem:[%s1322_s1] sm:$0xff]  ;;  %v911_v27 = vld [vmem:[%s1324_s3 + $0x8] sm:$0xff] }
  0xb6   : > { %v336_v34 = vpop.f32.mrf.mxu1  ;;  %v1202_v39 = vsel %vm318_vm3, %v620_v29, %v619_v33  ;;  %675 = vmatpush.bf16.msra.mxu1 %v911_v27  ;;  %v910_v28 = vld [vmem:[%s1324_s3] sm:$0xff] }
  0xb7   : > { %962 = vtanh.f32 %v335_v35 }
  0xb9   : > { %633 = vmatpush.bf16.msra.mxu0 %v908_v20 }
  0xba   : > { %676 = vmatpush.bf16.msra.mxu1 %v910_v28 }
  0xbd   : > { %v963_v40 = vpop.eup %962 }
  0xbe   : > { %v340_v41 = vrot.slane %v963_v40, 1  ;;  %343 = vst.msk [vmem:[#allocation2] sm:$0x1] %vm342_vm4, %v963_v40  ;;  %v345_v42 = vpack.c.bf16 %v963_v40, %v963_v40 }
  0xc0   : > { %344 = vst.msk [vmem:[#allocation2 + $0x8] sm:$0x1] %vm342_vm4, %v340_v41  ;;  %823 = vmatmul.msk.bf16.vlgmr.msra.gmra.mxu2 %vm321_vm2, %v345_v42 }
 0x143   : > { %v377_v46 = vpop.f32.mrf.mxu2 }
 0x144   : > { %v378_v47 = vadd.f32 %v377_v46, %v363_v23 }
 0x146   : > { %964 = vtanh.f32 %v378_v47 }
 0x14b   : > { %v379_v48 = vpop.f32.mrf.mxu2 }
 0x14c   : > { %v965_v49 = vpop.eup %964 }
 0x14d   : > { %v383_v50 = vrot.slane %v965_v49, 1  ;;  %385 = vst.msk [vmem:[#allocation2 + $0x1] sm:$0x1] %vm342_vm4, %v965_v49  ;;  %v387_v51 = vpack.c.bf16 %v965_v49, %v965_v49 }
 0x14f   : > { %386 = vst.msk [vmem:[#allocation2 + $0x9] sm:$0x1] %vm342_vm4, %v383_v50  ;;  %832 = vmatmul.msk.bf16.vlgmr.msra.gmra.mxu3 %vm321_vm2, %v387_v51 }
 0x1d2   : > { %v420_v54 = vpop.f32.mrf.mxu3 }
 0x1d3   : > { %v421_v55 = vadd.f32 %v420_v54, %v406_v31 }
 0x1d5   : > { %966 = vtanh.f32 %v421_v55 }
 0x1da   : > { %v422_v56 = vpop.f32.mrf.mxu3 }
 0x1db   : > { %v967_v57 = vpop.eup %966 }
 0x1dc   : > { %v426_v58 = vrot.slane %v967_v57, 1  ;;  %428 = vst.msk [vmem:[#allocation2 + $0x2] sm:$0x1] %vm342_vm4, %v967_v57  ;;  %v430_v59 = vpack.c.bf16 %v967_v57, %v967_v57 }
 0x1de   : > { %429 = vst.msk [vmem:[#allocation2 + $0xa] sm:$0x1] %vm342_vm4, %v426_v58  ;;  %841 = vmatmul.msk.bf16.vlgmr.msrb.gmra.mxu0 %vm321_vm2, %v430_v59 }
 0x25b   : > { %v463_v62 = vpop.f32.mrf.mxu0 }
 0x25c   : > { %v464_v63 = vadd.f32 %v463_v62, %v449_v32 }
 0x25e   : > { %968 = vtanh.f32 %v464_v63 }
 0x263   : > { %v465_v0 = vpop.f32.mrf.mxu0 }
 0x264   : > { %v969_v1 = vpop.eup %968 }
 0x265   : > { %v469_v2 = vrot.slane %v969_v1, 1  ;;  %471 = vst.msk [vmem:[#allocation2 + $0x3] sm:$0x1] %vm342_vm4, %v969_v1  ;;  %v473_v3 = vpack.c.bf16 %v969_v1, %v969_v1 }
 0x267   : > { %472 = vst.msk [vmem:[#allocation2 + $0xb] sm:$0x1] %vm342_vm4, %v469_v2  ;;  %850 = vmatmul.msk.bf16.vlgmr.msrb.gmra.mxu1 %vm321_vm2, %v473_v3 }
 0x2e4   : > { %v506_v6 = vpop.f32.mrf.mxu1 }
 0x2e5   : > { %v507_v7 = vadd.f32 %v506_v6, %v492_v36 }
 0x2e7   : > { %970 = vtanh.f32 %v507_v7 }
 0x2ec   : > { %v508_v8 = vpop.f32.mrf.mxu1 }
 0x2ed   : > { %v971_v9 = vpop.eup %970 }
 0x2ee   : > { %v512_v10 = vrot.slane %v971_v9, 1  ;;  %514 = vst.msk [vmem:[#allocation2 + $0x4] sm:$0x1] %vm342_vm4, %v971_v9  ;;  %v516_v11 = vpack.c.bf16 %v971_v9, %v971_v9 }
 0x2f0   : > { %515 = vst.msk [vmem:[#allocation2 + $0xc] sm:$0x1] %vm342_vm4, %v512_v10  ;;  %859 = vmatmul.msk.bf16.vlgmr.msrb.gmra.mxu2 %vm321_vm2, %v516_v11 }
 0x373   : > { %v549_v14 = vpop.f32.mrf.mxu2 }
 0x374   : > { %v550_v15 = vadd.f32 %v549_v14, %v1196_v37 }
 0x376   : > { %972 = vtanh.f32 %v550_v15 }
 0x37b   : > { %v551_v16 = vpop.f32.mrf.mxu2 }
 0x37c   : > { %v973_v17 = vpop.eup %972 }
 0x37d   : > { %v555_v18 = vrot.slane %v973_v17, 1  ;;  %557 = vst.msk [vmem:[#allocation2 + $0x5] sm:$0x1] %vm342_vm4, %v973_v17  ;;  %v559_v19 = vpack.c.bf16 %v973_v17, %v973_v17 }
 0x37f   : > { %558 = vst.msk [vmem:[#allocation2 + $0xd] sm:$0x1] %vm342_vm4, %v555_v18  ;;  %868 = vmatmul.msk.bf16.vlgmr.msrb.gmra.mxu3 %vm321_vm2, %v559_v19 }
 0x402   : > { %v592_v21 = vpop.f32.mrf.mxu3 }
 0x403   : > { %v593_v22 = vadd.f32 %v592_v21, %v1199_v38 }
 0x405   : > { %974 = vtanh.f32 %v593_v22 }
 0x40a   : > { %v594_v23 = vpop.f32.mrf.mxu3 }
 0x40b   : > { %v975_v24 = vpop.eup %974 }
 0x40c   : > { %v598_v25 = vrot.slane %v975_v24, 1  ;;  %600 = vst.msk [vmem:[#allocation2 + $0x6] sm:$0x1] %vm342_vm4, %v975_v24  ;;  %v602_v26 = vpack.c.bf16 %v975_v24, %v975_v24 }
 0x40e   : > { %601 = vst.msk [vmem:[#allocation2 + $0xe] sm:$0x1] %vm342_vm4, %v598_v25  ;;  %877 = vmatmul.msk.bf16.vlgmr.msra.gmra.mxu0 %vm321_vm2, %v602_v26 }
 0x48b   : > { %v635_v29 = vpop.f32.mrf.mxu0 }
 0x48c   : > { %v636_v30 = vadd.f32 %v635_v29, %v1202_v39 }
 0x48e   : > { %976 = vtanh.f32 %v636_v30 }
 0x493   : > { %v637_v31 = vpop.f32.mrf.mxu0 }
 0x494   : > { %v977_v32 = vpop.eup %976 }
 0x495   : > { %v641_v33 = vrot.slane %v977_v32, 1  ;;  %643 = vst.msk [vmem:[#allocation2 + $0x7] sm:$0x1] %vm342_vm4, %v977_v32 }
 0x496   : > { %646 = vst.msk [vmem:[#allocation6] sm:$0x3] %vm645_vm5, %v977_v32 }
 0x497   : > { %644 = vst.msk [vmem:[#allocation2 + $0xf] sm:$0x1] %vm342_vm4, %v641_v33  ;;  %914 = dma.vmem_to_hbm [thread:$0]  (%p127_p3), %s713_s11, 32, %s715_s16, [#allocation7]  }
 0x49c   : > { %v647_v34 = vld [vmem:[#allocation2] sm:$0xff] }
 0x49e   : > { %v648_v35 = vld [vmem:[#allocation2 + $0x8] sm:$0xff] }
 0x49f   : > { %v649_v36 = vpack.c.bf16 %v648_v35, %v647_v34 }
 0x4a1   : > { %886 = vmatmul.msk.bf16.vlgmr.msra.gmra.mxu1 %vm321_vm2, %v649_v36 }
 0x51e   : > { %v678_v37 = vpop.f32.mrf.mxu1 }
 0x51f   : > { %683 = vst.msk [vmem:[%s1171_s15] sm:$0xff] %vm321_vm2, %v678_v37 }
 0x526   : > { %v680_v38 = vpop.f32.mrf.mxu1 }
 0x527   : > { %684 = vst.msk [vmem:[%s1171_s15 + $0x8] sm:$0xff] %vm321_vm2, %v680_v38 }
 0x528   : > { %1033 = shalt.err (!%p1030_p10)
}
 0x529   : > { %s1076_s12 = smov 128   ;;  %s1077_s15 = smov 256  }
 0x52a   : > { %s1078_s17 = smov 8  }
 0x52b   : > { %912 = dma.vmem_to_hbm [thread:$0]  (%p1150_p6), %s698_s30, 256, %s700_s6, %s686_s7, %s1076_s12, %s1077_s15, %s1078_s17  }
 0x52c   : > { %1051 = dma.done.wait (%p127_p3), [#allocation7], 32  }
 0x52d   : > { %1053 = vsyncadd (%p127_p3), [#allocation7], 4294967264 }
 0x52e PF: > { %s731_s23 = sand.u32 1, %s1060_s18   ;;  %p919_p11 = pnand %p794_p9, %p1154_p8 }
 0x52f   : > { %s732_s25 = scalar_lea.sflag [#allocation5], %s731_s23 }
 0x530   : > { %p920_p12 = pneg %p919_p11 }
 0x532   : > { %1055 = dma.done.wait (%p920_p12), %s732_s25, 256  }
 0x533   : > { %1057 = vsyncadd (%p920_p12), %s732_s25, 4294967040  ;;  %p17_p6 = scmp.ge.s32.totalorder %s1134_s24, 4   ;;  %s1329_s18 = smov %s1064_s19 }
 0x534   : > { %s1330_s19 = smov %s1068_s20  ;;  %s1331_s20 = smov %s1146_s27 }
 0x535   : > { %s1332_s21 = smov %s1134_s24  ;;  %19 = sbr.rel (!%p17_p6) target bundleno = 4 (0x4), region = 126 }
 0x53a   :  { %738 = vsyncpa [#allocation5], 1 }
 0x53b   :  { %740 = vsyncpa [#allocation5 + $0x1], 1 }
 0x53c   :  { %741 = vsyncpa [#allocation7], 1 }

</bundles_post_ra>
